<compile_context>
chip_gen: v7x
topology: tpu7x:2x2x1
jax: 0.10.0
libtpu: 0.0.40
codegen_flags: <defaults>
</compile_context>

<pallas_src>
import functools

import jax
import jax.numpy as jnp
from jax.experimental import pallas as pl
from jax.experimental.pallas import tpu as pltpu


def _dice_ce_kernel(logits_ref, labels_ref,
                    ce_out, int_out, z_out,
                    ce_acc, int_acc, z_acc,
                    *, softmax, sub_n, n_sub, tile_n, hw,
                    steps_per_split, masked):
    i = pl.program_id(2)                      # pixel-tile index (reduction axis)

    @pl.when(i == 0)
    def _init():
        ce_acc[...] = jnp.zeros_like(ce_acc)
        int_acc[...] = jnp.zeros_like(int_acc)
        z_acc[...] = jnp.zeros_like(z_acc)

    C = int_acc.shape[0]
    # Hoisted above the inner loop: JAX does not CSE broadcast_in_dim.
    cls_iota = jax.lax.broadcasted_iota(jnp.int32, (C, sub_n), 0)
    if masked:
        lane_iota = jax.lax.broadcasted_iota(jnp.int32, (1, sub_n), 1)
        block_base = (pl.program_id(1) * steps_per_split + i) * tile_n

    def chunk(j, carry):
        ce_c, int_c, z_c = carry
        off = j * sub_n
        if (sub_n % 128 == 0) and not isinstance(off, int):
            off = pl.multiple_of(off, 128)
        x = logits_ref[0, :, pl.ds(off, sub_n)].astype(jnp.float32)    # (C, sub_n)
        lab = labels_ref[0, :, pl.ds(off, sub_n)]                      # (1, sub_n)
        if masked:
            valid = (block_base + off + lane_iota) < hw                # (1, sub_n)
            x = jnp.where(valid, x, 0.0)       # OOB garbage -> safe zeros
            lab = jnp.where(valid, lab, -1)    # no class matches -> onehot = 0
            vmask = valid.astype(jnp.float32)
        onehot = (cls_iota == lab).astype(jnp.float32)                 # (C, sub_n)

        # --- Cross entropy (numerically stable), lane-wide partials ---
        m = jnp.max(x, axis=0, keepdims=True)                          # (1, sub_n)
        e = jnp.exp(x - m)                                             # (C, sub_n)
        s = jnp.sum(e, axis=0, keepdims=True)                          # (1, sub_n)
        logit_at = jnp.sum(x * onehot, axis=0, keepdims=True)          # (1, sub_n)
        ce = jnp.log(s) + m - logit_at

        # --- Dice statistics, lane-wide partials (pure VPU adds) ---
        if softmax:
            r = pl.reciprocal(s, approx=True)          # EUP slot
            r = r * (2.0 - s * r)                      # one Newton step -> ~f32 exact
            score = e * r
        else:
            score = x
        ic = score * onehot
        zc = score * score
        if masked:
            ce = ce * vmask
            zc = zc * vmask
            # ic is already zero on invalid lanes (lab == -1 -> onehot == 0)
        return ce_c + ce, int_c + ic, z_c + zc

    zero = (jnp.zeros((1, sub_n), jnp.float32),
            jnp.zeros((C, sub_n), jnp.float32),
            jnp.zeros((C, sub_n), jnp.float32))
    if n_sub == 1:
        ce_c, int_c, z_c = chunk(0, zero)
    else:
        ce_c, int_c, z_c = jax.lax.fori_loop(0, n_sub, chunk, zero,
                                             unroll=min(n_sub, 8))

    # One (C, sub_n)-wide scratch RMW per grid step (not per sub-chunk).
    ce_acc[...] += ce_c
    int_acc[...] += int_c
    z_acc[...] += z_c

    @pl.when(i == pl.num_programs(2) - 1)
    def _finalize():
        # Cross-lane reductions exactly once per (batch, split); outputs are
        # lane-dense 128-wide slabs -> unmasked stores.
        ce_part = jnp.sum(ce_acc[...])                                  # scalar
        int_part = jnp.sum(int_acc[...], axis=1, keepdims=True)        # (C, 1)
        z_part = jnp.sum(z_acc[...], axis=1, keepdims=True)            # (C, 1)
        ce_out[...] = jnp.full(ce_out.shape, ce_part, dtype=jnp.float32)
        int_out[...] = jnp.broadcast_to(int_part[None, None], int_out.shape)
        z_out[...] = jnp.broadcast_to(z_part[None, None], z_out.shape)


def _pick_tile_n(hw, c, max_tile_n):
    """Pick the per-grid-step pixel tile.  Returns (tile_n, masked)."""
    if hw < 128:
        return hw, False                      # one full-row (full-dim) block
    # VMEM budget per lane: double-buffered logits+labels + accumulator scratch.
    bytes_per_lane = 2 * (c * 4 + 4) + (1 + 2 * c) * 4
    vmem_cap = max(128, (8 * 1024 * 1024 // bytes_per_lane) // 128 * 128)
    max_eff = max(128, min((max_tile_n // 128) * 128, vmem_cap))
    if hw % 128 == 0:
        t = min(max_eff, hw) // 128 * 128
        while t >= 128:
            if hw % t == 0:
                return t, False
            t -= 128
        return 128, False
    # Masked-tail path: largest 128-multiple tile <= hw, cdiv grid + lane mask.
    return min(max_eff, (hw // 128) * 128), True


def _pick_sub_n(tile_n, c):
    """Inner sub-chunk width: ~4 vregs per (C, sub_n) f32 carry, divides tile_n."""
    if tile_n % 128 != 0:
        return tile_n                          # hw < 128 single-chunk case
    c_pad = -(-c // 8) * 8
    target = max(128, (4096 // c_pad) // 128 * 128)
    t = min(target, tile_n)
    while t >= 128:
        if tile_n % t == 0:
            return t
        t -= 128
    return 128


def dice_ce_loss(y_hat, y, *, num_classes, p, softmax=True, max_tile_n=16384):
    """y_hat: (B, C, H, W) logits (any float dtype).  y: (B, H, W) int labels."""
    B, C, H, W = y_hat.shape
    assert C == num_classes
    HW = H * W

    tile_n, masked = _pick_tile_n(HW, C, max_tile_n)
    if masked:
        steps_total = -(-HW // tile_n)
        nsplit = 1
    else:
        steps_total = HW // tile_n
        # v7x: with a single batch element, make sure there is something to
        # split across the two TensorCores.
        if B == 1 and steps_total == 1 and tile_n % 256 == 0:
            tile_n //= 2
            steps_total = HW // tile_n
        nsplit = 2 if (B == 1 and steps_total >= 2 and steps_total % 2 == 0) else 1
    steps_per_split = steps_total // nsplit
    sub_n = _pick_sub_n(tile_n, C)
    n_sub = tile_n // sub_n

    logits = y_hat.reshape(B, C, HW)                  # free reshape, no transpose
    labels = y.reshape(B, 1, HW).astype(jnp.int32)
    # TODO(synk): ship labels as int8 and widen in-kernel to cut label HBM bytes 4x.

    kernel = functools.partial(
        _dice_ce_kernel, softmax=softmax, sub_n=sub_n, n_sub=n_sub,
        tile_n=tile_n, hw=HW, steps_per_split=steps_per_split, masked=masked)

    grid = (B, nsplit, steps_per_split)

    # Explicit VMEM budget (double-buffered inputs + scratch + outputs).
    vmem_bytes = (2 * tile_n * (C * logits.dtype.itemsize + 4)
                  + (1 + 2 * C) * sub_n * 4
                  + 2 * (2 * C + 1) * 128 * 4)
    cp = dict(dimension_semantics=("parallel", "parallel", "arbitrary"))
    if vmem_bytes > 12 * 1024 * 1024:
        cp["vmem_limit_bytes"] = int(vmem_bytes * 3 // 2)

    ce_part, int_part, z_part = pl.pallas_call(
        kernel,
        out_shape=(
            jax.ShapeDtypeStruct((B, nsplit, 1, 128), jnp.float32),   # CE partial
            jax.ShapeDtypeStruct((B, nsplit, C, 128), jnp.float32),   # sum(score*target)
            jax.ShapeDtypeStruct((B, nsplit, C, 128), jnp.float32),   # sum(score^2)
        ),
        grid_spec=pltpu.PrefetchScalarGridSpec(
            num_scalar_prefetch=0,
            grid=grid,
            in_specs=[
                pl.BlockSpec((1, C, tile_n),
                             lambda b, s, i: (b, 0, s * steps_per_split + i)),
                pl.BlockSpec((1, 1, tile_n),
                             lambda b, s, i: (b, 0, s * steps_per_split + i)),
            ],
            out_specs=(
                pl.BlockSpec((1, 1, 1, 128), lambda b, s, i: (b, s, 0, 0)),
                pl.BlockSpec((1, 1, C, 128), lambda b, s, i: (b, s, 0, 0)),
                pl.BlockSpec((1, 1, C, 128), lambda b, s, i: (b, s, 0, 0)),
            ),
            scratch_shapes=[
                pltpu.VMEM((1, sub_n), jnp.float32),   # CE lane-wide partials
                pltpu.VMEM((C, sub_n), jnp.float32),   # intersect partials
                pltpu.VMEM((C, sub_n), jnp.float32),   # sum(score^2) partials
            ],
        ),
        compiler_params=pltpu.CompilerParams(**cp),
    )(logits, labels)

    # Tiny scalar combine of per-(batch, split) partials (plain JAX).
    smooth = 1e-5
    total_n = float(B * HW)
    ce = jnp.sum(ce_part[:, :, 0, 0]) / total_n
    intersect = jnp.sum(int_part[:, :, :, 0], axis=(0, 1))            # (C,)
    z_sum = jnp.sum(z_part[:, :, :, 0], axis=(0, 1))                  # (C,)
    # Per-class label counts == sum(target^2); touches only the int labels.
    y_sum = jnp.bincount(y.reshape(-1).astype(jnp.int32),
                         length=num_classes).astype(jnp.float32)      # (C,)
    dice_c = 1.0 - (2.0 * intersect + smooth) / (z_sum + y_sum + smooth)
    dice_loss = jnp.sum(dice_c) / float(num_classes)
    return ce * float(p) + dice_loss * (1.0 - float(p))


def _reference_dice_ce(y_hat, y, *, num_classes, p, softmax=True):
    """Pure-JAX reference matching the PyTorch module semantics."""
    logits = y_hat.astype(jnp.float32)
    lse = jax.nn.logsumexp(logits, axis=1)                            # (B, H, W)
    logit_at = jnp.take_along_axis(logits, y[:, None].astype(jnp.int32),
                                   axis=1)[:, 0]                      # (B, H, W)
    ce = jnp.mean(lse - logit_at)
    score = jax.nn.softmax(logits, axis=1) if softmax else logits
    onehot = jax.nn.one_hot(y, num_classes, axis=1, dtype=jnp.float32)
    smooth = 1e-5
    loss = 0.0
    for i in range(num_classes):
        s_i = score[:, i]
        t_i = onehot[:, i]
        intersect = jnp.sum(s_i * t_i)
        y_s = jnp.sum(t_i * t_i)
        z_s = jnp.sum(s_i * s_i)
        loss = loss + (1.0 - (2.0 * intersect + smooth) / (z_s + y_s + smooth))
    return ce * p + (loss / num_classes) * (1.0 - p)


def _check(key, B, C, H, W, p, softmax, max_tile_n):
    k1, k2 = jax.random.split(key)
    y_hat = jax.random.normal(k1, (B, C, H, W), dtype=jnp.float32)
    y = jax.random.randint(k2, (B, H, W), 0, C, dtype=jnp.int32)
    out = dice_ce_loss(y_hat, y, num_classes=C, p=p, softmax=softmax,
                       max_tile_n=max_tile_n)
    out = jax.block_until_ready(out)
    ref = jax.block_until_ready(
        _reference_dice_ce(y_hat, y, num_classes=C, p=p, softmax=softmax))
    assert jnp.allclose(out, ref, atol=1e-5, rtol=1e-5), (out, ref)


if __name__ == "__main__":
    key = jax.random.PRNGKey(0)
    k_main, k_split, k_mask = jax.random.split(key, 3)

    # Main case: NCHW logits like the PyTorch module (B=2, C=4, 16x16).
    _check(k_main, B=2, C=4, H=16, W=16, p=0.5, softmax=True, max_tile_n=16384)

    # Exercise the B==1 two-way pixel split (v7x), multi-step accumulation and
    # the inner vreg-carried sub-chunk loop.
    _check(k_split, B=1, C=4, H=64, W=64, p=0.3, softmax=True, max_tile_n=1024)

    # Exercise the masked-tail path (H*W not divisible by 128).
    _check(k_mask, B=2, C=3, H=20, W=20, p=0.5, softmax=True, max_tile_n=16384)

    print("KERNEL_OK")
</pallas_src>

<mosaic_0001>
module attributes {stable_mosaic.version = 11 : i64} {
  func.func @_dice_ce_kernel(%arg0: i32, %arg1: i32, %arg2: i32, %arg3: memref<1x4x256xf32, #tpu.memory_space<vmem>>, %arg4: memref<1x1x256xi32, #tpu.memory_space<vmem>>, %arg5: memref<1x1x1x128xf32, #tpu.memory_space<vmem>>, %arg6: memref<1x1x4x128xf32, #tpu.memory_space<vmem>>, %arg7: memref<1x1x4x128xf32, #tpu.memory_space<vmem>>, %arg8: memref<1x256xf32, #tpu.memory_space<vmem>>, %arg9: memref<4x256xf32, #tpu.memory_space<vmem>>, %arg10: memref<4x256xf32, #tpu.memory_space<vmem>>) attributes {dimension_semantics = [#tpu.dimension_semantics<parallel>, #tpu.dimension_semantics<parallel>, #tpu.dimension_semantics<arbitrary>], iteration_bounds = array<i64: 2, 1, 1>, scalar_prefetch = 0 : i64, scratch_operands = 3 : i64, tpu.core_type = #tpu.core_type<tc>, window_params = [{transform_indices = @transform_0, window_bounds = array<i64: 1, 4, 256>}, {transform_indices = @transform_1, window_bounds = array<i64: 1, 1, 256>}, {transform_indices = @transform_2, window_bounds = array<i64: 1, 1, 1, 128>}, {transform_indices = @transform_3, window_bounds = array<i64: 1, 1, 4, 128>}, {transform_indices = @transform_4, window_bounds = array<i64: 1, 1, 4, 128>}]} {
    %c0_i32 = arith.constant 0 : i32
    %0 = arith.cmpi eq, %arg2, %c0_i32 : i32
    %1 = arith.extui %0 : i1 to i32
    %c0_i32_0 = arith.constant 0 : i32
    %2 = arith.cmpi ne, %1, %c0_i32_0 : i32
    scf.if %2 {
      %cst_26 = arith.constant 0.000000e+00 : f32
      %52 = vector.broadcast %cst_26 : f32 to vector<1x256xf32>
      %c0_27 = arith.constant 0 : index
      %c0_28 = arith.constant 0 : index
      %53 = vector.load %arg8[%c0_27, %c0_28] : memref<1x256xf32, #tpu.memory_space<vmem>>, vector<1x256xf32>
      tpu.vector_store %arg8[%c0_27, %c0_28], %52 {strides = array<i32>} : memref<1x256xf32, #tpu.memory_space<vmem>>, vector<1x256xf32>,
      %cst_29 = arith.constant 0.000000e+00 : f32
      %54 = vector.broadcast %cst_29 : f32 to vector<4x256xf32>
      %c0_30 = arith.constant 0 : index
      %c0_31 = arith.constant 0 : index
      %55 = vector.load %arg9[%c0_30, %c0_31] : memref<4x256xf32, #tpu.memory_space<vmem>>, vector<4x256xf32>
      tpu.vector_store %arg9[%c0_30, %c0_31], %54 {strides = array<i32>} : memref<4x256xf32, #tpu.memory_space<vmem>>, vector<4x256xf32>,
      %cst_32 = arith.constant 0.000000e+00 : f32
      %56 = vector.broadcast %cst_32 : f32 to vector<4x256xf32>
      %c0_33 = arith.constant 0 : index
      %c0_34 = arith.constant 0 : index
      %57 = vector.load %arg10[%c0_33, %c0_34] : memref<4x256xf32, #tpu.memory_space<vmem>>, vector<4x256xf32>
      tpu.vector_store %arg10[%c0_33, %c0_34], %56 {strides = array<i32>} : memref<4x256xf32, #tpu.memory_space<vmem>>, vector<4x256xf32>,
    } else {
    }
    %3 = tpu.iota {dimensions = array<i32: 0>} : vector<4x256xi32>
    %cst = arith.constant 0.000000e+00 : f32
    %4 = vector.broadcast %cst : f32 to vector<1x256xf32>
    %cst_1 = arith.constant 0.000000e+00 : f32
    %5 = vector.broadcast %cst_1 : f32 to vector<4x256xf32>
    %cst_2 = arith.constant 0.000000e+00 : f32
    %6 = vector.broadcast %cst_2 : f32 to vector<4x256xf32>
    %c0 = arith.constant 0 : index
    %c0_3 = arith.constant 0 : index
    %c0_4 = arith.constant 0 : index
    %7 = vector.load %arg3[%c0, %c0_3, %c0_4] : memref<1x4x256xf32, #tpu.memory_space<vmem>>, vector<1x4x256xf32>
    %8 = vector.shape_cast %7 : vector<1x4x256xf32> to vector<4x256xf32>
    %c0_5 = arith.constant 0 : index
    %c0_6 = arith.constant 0 : index
    %c0_7 = arith.constant 0 : index
    %9 = vector.load %arg4[%c0_5, %c0_6, %c0_7] : memref<1x1x256xi32, #tpu.memory_space<vmem>>, vector<1x1x256xi32>
    %10 = vector.shape_cast %9 : vector<1x1x256xi32> to vector<1x256xi32>
    %11 = vector.broadcast %10 : vector<1x256xi32> to vector<4x256xi32>
    %12 = arith.cmpi eq, %3, %11 : vector<4x256xi32>
    %13 = arith.extui %12 : vector<4x256xi1> to vector<4x256xi32>
    %14 = arith.sitofp %13 : vector<4x256xi32> to vector<4x256xf32>
    %cst_8 = arith.constant dense<0xFF800000> : vector<256xf32>
    %15 = vector.multi_reduction <maximumf>, %8, %cst_8 [0] : vector<4x256xf32> to vector<256xf32>
    %16 = vector.shape_cast %15 : vector<256xf32> to vector<1x256xf32>
    %17 = vector.broadcast %16 : vector<1x256xf32> to vector<4x256xf32>
    %18 = arith.subf %8, %17 : vector<4x256xf32>
    %19 = math.exp %18 : vector<4x256xf32>
    %cst_9 = arith.constant dense<0.000000e+00> : vector<256xf32>
    %20 = vector.multi_reduction <add>, %19, %cst_9 [0] : vector<4x256xf32> to vector<256xf32>
    %21 = vector.shape_cast %20 : vector<256xf32> to vector<1x256xf32>
    %22 = arith.mulf %8, %14 : vector<4x256xf32>
    %cst_10 = arith.constant dense<0.000000e+00> : vector<256xf32>
    %23 = vector.multi_reduction <add>, %22, %cst_10 [0] : vector<4x256xf32> to vector<256xf32>
    %24 = vector.shape_cast %23 : vector<256xf32> to vector<1x256xf32>
    %25 = math.log %21 : vector<1x256xf32>
    %26 = arith.addf %25, %16 : vector<1x256xf32>
    %27 = arith.subf %26, %24 : vector<1x256xf32>
    %28 = tpu.reciprocal %21 {approx = true} : vector<1x256xf32> -> vector<1x256xf32>
    %29 = arith.mulf %21, %28 : vector<1x256xf32>
    %cst_11 = arith.constant 2.000000e+00 : f32
    %30 = vector.broadcast %cst_11 : f32 to vector<1x256xf32>
    %31 = arith.subf %30, %29 : vector<1x256xf32>
    %32 = arith.mulf %28, %31 : vector<1x256xf32>
    %33 = vector.broadcast %32 : vector<1x256xf32> to vector<4x256xf32>
    %34 = arith.mulf %19, %33 : vector<4x256xf32>
    %35 = arith.mulf %34, %14 : vector<4x256xf32>
    %36 = arith.mulf %34, %34 : vector<4x256xf32>
    %37 = arith.addf %4, %27 : vector<1x256xf32>
    %38 = arith.addf %5, %35 : vector<4x256xf32>
    %39 = arith.addf %6, %36 : vector<4x256xf32>
    %c0_12 = arith.constant 0 : index
    %c0_13 = arith.constant 0 : index
    %40 = vector.load %arg8[%c0_12, %c0_13] : memref<1x256xf32, #tpu.memory_space<vmem>>, vector<1x256xf32>
    %41 = arith.addf %40, %37 : vector<1x256xf32>
    %c0_14 = arith.constant 0 : index
    %c0_15 = arith.constant 0 : index
    %42 = vector.load %arg8[%c0_14, %c0_15] : memref<1x256xf32, #tpu.memory_space<vmem>>, vector<1x256xf32>
    tpu.vector_store %arg8[%c0_14, %c0_15], %41 {strides = array<i32>} : memref<1x256xf32, #tpu.memory_space<vmem>>, vector<1x256xf32>,
    %c0_16 = arith.constant 0 : index
    %c0_17 = arith.constant 0 : index
    %43 = vector.load %arg9[%c0_16, %c0_17] : memref<4x256xf32, #tpu.memory_space<vmem>>, vector<4x256xf32>
    %44 = arith.addf %43, %38 : vector<4x256xf32>
    %c0_18 = arith.constant 0 : index
    %c0_19 = arith.constant 0 : index
    %45 = vector.load %arg9[%c0_18, %c0_19] : memref<4x256xf32, #tpu.memory_space<vmem>>, vector<4x256xf32>
    tpu.vector_store %arg9[%c0_18, %c0_19], %44 {strides = array<i32>} : memref<4x256xf32, #tpu.memory_space<vmem>>, vector<4x256xf32>,
    %c0_20 = arith.constant 0 : index
    %c0_21 = arith.constant 0 : index
    %46 = vector.load %arg10[%c0_20, %c0_21] : memref<4x256xf32, #tpu.memory_space<vmem>>, vector<4x256xf32>
    %47 = arith.addf %46, %39 : vector<4x256xf32>
    %c0_22 = arith.constant 0 : index
    %c0_23 = arith.constant 0 : index
    %48 = vector.load %arg10[%c0_22, %c0_23] : memref<4x256xf32, #tpu.memory_space<vmem>>, vector<4x256xf32>
    tpu.vector_store %arg10[%c0_22, %c0_23], %47 {strides = array<i32>} : memref<4x256xf32, #tpu.memory_space<vmem>>, vector<4x256xf32>,
    %c0_i32_24 = arith.constant 0 : i32
    %49 = arith.cmpi eq, %arg2, %c0_i32_24 : i32
    %50 = arith.extui %49 : i1 to i32
    %c0_i32_25 = arith.constant 0 : i32
    %51 = arith.cmpi ne, %50, %c0_i32_25 : i32
    scf.if %51 {
      %c0_26 = arith.constant 0 : index
      %c0_27 = arith.constant 0 : index
      %52 = vector.load %arg8[%c0_26, %c0_27] : memref<1x256xf32, #tpu.memory_space<vmem>>, vector<1x256xf32>
      %53 = vector.shape_cast %52 : vector<1x256xf32> to vector<1x1x256xf32>
      %cst_28 = arith.constant dense<0.000000e+00> : vector<1xf32>
      %54 = vector.multi_reduction <add>, %53, %cst_28 [1, 2] : vector<1x1x256xf32> to vector<1xf32>
      %55 = vector.shape_cast %54 : vector<1xf32> to vector<1x1x1xf32>
      %56 = vector.extract %55[0, 0, 0] : f32 from vector<1x1x1xf32>
      %c0_29 = arith.constant 0 : index
      %c0_30 = arith.constant 0 : index
      %57 = vector.load %arg9[%c0_29, %c0_30] : memref<4x256xf32, #tpu.memory_space<vmem>>, vector<4x256xf32>
      %cst_31 = arith.constant dense<0.000000e+00> : vector<4xf32>
      %58 = vector.multi_reduction <add>, %57, %cst_31 [1] : vector<4x256xf32> to vector<4xf32>
      %59 = vector.shape_cast %58 : vector<4xf32> to vector<4x1xf32>
      %c0_32 = arith.constant 0 : index
      %c0_33 = arith.constant 0 : index
      %60 = vector.load %arg10[%c0_32, %c0_33] : memref<4x256xf32, #tpu.memory_space<vmem>>, vector<4x256xf32>
      %cst_34 = arith.constant dense<0.000000e+00> : vector<4xf32>
      %61 = vector.multi_reduction <add>, %60, %cst_34 [1] : vector<4x256xf32> to vector<4xf32>
      %62 = vector.shape_cast %61 : vector<4xf32> to vector<4x1xf32>
      %63 = vector.broadcast %56 : f32 to vector<1x1x1x128xf32>
      %c0_35 = arith.constant 0 : index
      %c0_36 = arith.constant 0 : index
      %c0_37 = arith.constant 0 : index
      %c0_38 = arith.constant 0 : index
      %64 = vector.load %arg5[%c0_35, %c0_36, %c0_37, %c0_38] : memref<1x1x1x128xf32, #tpu.memory_space<vmem>>, vector<1x1x1x128xf32>
      tpu.vector_store %arg5[%c0_35, %c0_36, %c0_37, %c0_38], %63 {strides = array<i32>} : memref<1x1x1x128xf32, #tpu.memory_space<vmem>>, vector<1x1x1x128xf32>,
      %65 = vector.shape_cast %59 : vector<4x1xf32> to vector<1x1x4x1xf32>
      %66 = vector.shape_cast %65 : vector<1x1x4x1xf32> to vector<1x1x4x1xf32>
      %67 = vector.broadcast %66 : vector<1x1x4x1xf32> to vector<1x1x4x128xf32>
      %c0_39 = arith.constant 0 : index
      %c0_40 = arith.constant 0 : index
      %c0_41 = arith.constant 0 : index
      %c0_42 = arith.constant 0 : index
      %68 = vector.load %arg6[%c0_39, %c0_40, %c0_41, %c0_42] : memref<1x1x4x128xf32, #tpu.memory_space<vmem>>, vector<1x1x4x128xf32>
      tpu.vector_store %arg6[%c0_39, %c0_40, %c0_41, %c0_42], %67 {strides = array<i32>} : memref<1x1x4x128xf32, #tpu.memory_space<vmem>>, vector<1x1x4x128xf32>,
      %69 = vector.shape_cast %62 : vector<4x1xf32> to vector<1x1x4x1xf32>
      %70 = vector.shape_cast %69 : vector<1x1x4x1xf32> to vector<1x1x4x1xf32>
      %71 = vector.broadcast %70 : vector<1x1x4x1xf32> to vector<1x1x4x128xf32>
      %c0_43 = arith.constant 0 : index
      %c0_44 = arith.constant 0 : index
      %c0_45 = arith.constant 0 : index
      %c0_46 = arith.constant 0 : index
      %72 = vector.load %arg7[%c0_43, %c0_44, %c0_45, %c0_46] : memref<1x1x4x128xf32, #tpu.memory_space<vmem>>, vector<1x1x4x128xf32>
      tpu.vector_store %arg7[%c0_43, %c0_44, %c0_45, %c0_46], %71 {strides = array<i32>} : memref<1x1x4x128xf32, #tpu.memory_space<vmem>>, vector<1x1x4x128xf32>,
    } else {
    }
    return
  }
  func.func @transform_0(%arg0: i32, %arg1: i32, %arg2: i32) -> (i32, i32, i32) {
    %c1_i32 = arith.constant 1 : i32
    %0 = arith.muli %arg1, %c1_i32 : i32
    %1 = arith.addi %0, %arg2 : i32
    %c0_i32 = arith.constant 0 : i32
    %c0_i32_0 = arith.constant 0 : i32
    return %arg0, %c0_i32, %1 : i32, i32, i32
  }
  func.func @transform_1(%arg0: i32, %arg1: i32, %arg2: i32) -> (i32, i32, i32) {
    %c1_i32 = arith.constant 1 : i32
    %0 = arith.muli %arg1, %c1_i32 : i32
    %1 = arith.addi %0, %arg2 : i32
    %c0_i32 = arith.constant 0 : i32
    %c0_i32_0 = arith.constant 0 : i32
    return %arg0, %c0_i32, %1 : i32, i32, i32
  }
  func.func @transform_2(%arg0: i32, %arg1: i32, %arg2: i32) -> (i32, i32, i32, i32) {
    %c0_i32 = arith.constant 0 : i32
    %c0_i32_0 = arith.constant 0 : i32
    %c0_i32_1 = arith.constant 0 : i32
    return %arg0, %arg1, %c0_i32, %c0_i32_0 : i32, i32, i32, i32
  }
  func.func @transform_3(%arg0: i32, %arg1: i32, %arg2: i32) -> (i32, i32, i32, i32) {
    %c0_i32 = arith.constant 0 : i32
    %c0_i32_0 = arith.constant 0 : i32
    %c0_i32_1 = arith.constant 0 : i32
    return %arg0, %arg1, %c0_i32, %c0_i32_0 : i32, i32, i32, i32
  }
  func.func @transform_4(%arg0: i32, %arg1: i32, %arg2: i32) -> (i32, i32, i32, i32) {
    %c0_i32 = arith.constant 0 : i32
    %c0_i32_0 = arith.constant 0 : i32
    %c0_i32_1 = arith.constant 0 : i32
    return %arg0, %arg1, %c0_i32, %c0_i32_0 : i32, i32, i32, i32
  }
}

</mosaic_0001>

<bundles_post_ra>
// kernel: tpu_custom_call.1
= control target key start
LH: loop header
LB: loop body
LE: loop exit
PB: predicated region body
PF: predicated region fallthrough
CT: control target
= control target key end

     0   :  { %10 = vsyncpa [#allocation6], 0  ;;  %s1419_s0 = inlined_call_operand.hbm [shape: f32[2,4,256], index: 0, kind: input, shape index: {}]   ;;  %s1420_s1 = inlined_call_operand.hbm [shape: s32[2,1,256], index: 1, kind: input, shape index: {}]   ;;  %s1421_s2 = inlined_call_operand.hbm [shape: f32[2,1,1,128], index: 2, kind: output, shape index: {0}]   ;;  %s1422_s3 = inlined_call_operand.hbm [shape: f32[2,1,4,128], index: 3, kind: output, shape index: {1}]   ;;  %s1423_s4 = inlined_call_operand.hbm [shape: f32[2,1,4,128], index: 4, kind: output, shape index: {2}]  }
   0x1   :  { %12 = vsyncpa [#allocation6 + $0x1], 0 }
   0x2   :  { %13 = vsyncpa [#allocation9], 0 }
   0x3   :  { %15 = vsyncpa [#allocation9 + $0x1], 0 }
   0x4   :  { %16 = vsyncpa [#allocation7], 0 }
   0x5   :  { %18 = vsyncpa [#allocation7 + $0x1], 0 }
   0x6   :  { %19 = vsyncpa [#allocation12], 0 }
   0x7   :  { %21 = vsyncpa [#allocation12 + $0x1], 0  ;;  %s1095_s15 = smov 0   ;;  %s1097_s16 = smov 0  }
   0x8   :  { %s1099_s17 = smov 0   ;;  %s1101_s18 = smov 0  }
   0x9   :  { %s1103_s19 = smov 0   ;;  %s1105_s20 = smov 0  }
   0xa LB: > { %s1126_s21 = sadd.s32 4294967295, %s1061_s20   ;;  %s1425_s22 = sadd.s32 4294967294, %s1061_s20   ;;  %s1061_s20 = sphi %s1105_s20, %s27_s20   ;;  %s1057_s19 = sphi %s1103_s19, %s1447_s19   ;;  %s1053_s18 = sphi %s1101_s18, %s1446_s18   ;;  %s1049_s17 = sphi %s1099_s17, %s1445_s17   ;;  %s1045_s16 = sphi %s1097_s16, %s1444_s16   ;;  %s1041_s15 = sphi %s1095_s15, %s1443_s15  }
   0xb   : > { %s46_s23 = sadd.s32 1, %s1057_s19  ;;  %s57_s24 = sadd.s32 1, %s1049_s17 }
   0xc   : > { %p48_p0 = scmp.ge.s32.totalorder %s46_s23, 2  ;;  %p64_p1 = scmp.ne.s32.totalorder %s1049_s17, %s1045_s16 }
   0xd   : > { %p65_p2 = scmp.eq.s32.totalorder %s1061_s20, 0  ;;  %p70_p3 = scmp.ne.s32.totalorder %s1045_s16, %s1041_s15 }
   0xe   : > { %s1449_s23 = smov (%p48_p0, %s46_s23), 0  ;;  %p71_p5 = scmp.eq.s32.totalorder %s1126_s21, 0 }
   0xf   : > { %p1138_p4 = por %p65_p2, %p64_p1  ;;  %s52_s26 = ssub.s32 %s1057_s19, %s1449_s23 }
  0x10   : > { %p126_p6 = scmp.eq.s32.totalorder %s1126_s21, 1  ;;  %p55_p7 = scmp.eq.s32.totalorder %s52_s26, 0 }
  0x11   : > { %p1146_p8 = por %p71_p5, %p70_p3  ;;  %p132_p10 = scmp.eq.s32.totalorder %s1425_s22, 1 }
  0x12   : > { %p1150_p9 = por %p126_p6, %p64_p1  ;;  %p792_p13 = scmp.lt.s32.totalorder %s1061_s20, 2 }
  0x13   : > { %s1428_s27 = scalar_select %p1146_p8, 1, 0 }
  0x14   : > { %s1429_s28 = scalar_select %p1150_p9, 1, 0 }
  0x15   : > { %s1157_s29 = scalar_select %p55_p7, %s1049_s17, %s57_s24  }
  0x16   : > { %p1159_p11 = por %p132_p10, %p70_p3  ;;  %s1166_s5 = sand.u32 1, %s1049_s17  }
  0x17   : > { %s741_s6 = sshll.u32 %s1166_s5, 3  ;;  %s761_s7 = sshll.u32 %s1057_s19, 7 }
  0x18   : > { %s1430_s30 = scalar_select %p1159_p11, 1, 0 }
  0x19   : > { %s1173_s10 = scalar_lea.hbm %s1419_s0, %s761_s7  ;;  %s212_s11 = scalar_lea.vmem [#allocation5], %s741_s6 }
  0x1a   : > { %s223_s12 = sshll.u32 %s212_s11, 4  ;;  %p1179_p0 = pnand %p792_p13, %p1138_p4  ;;  %s1175_s12 = int_to_ptr.vmem [resolvable:$true] %s223_s12 }
  0x1b   : > { %s209_s14 = scalar_lea.sflag [#allocation6], %s1166_s5  ;;  %s855_s24 = scalar_lea.hbm %s1173_s10, 128 }
  0x1c   : > { %p856_p3 = scmp.ne.s32.totalorder %s1173_s10, %s855_s24  ;;  %p857_p5 = pneg %p1179_p0 }
  0x1d   : > { %s860_s25 = scalar_lea.hbm %s1419_s0, 256  ;;  %p861_p4 = scmp.lt.u32.totalorder %s1173_s10, %s1419_s0 }
  0x1e   : > { %p858_p6 = pnand %p857_p5, %p856_p3  ;;  %p862_p10 = scmp.lt.u32.totalorder %s860_s25, %s855_s24 }
  0x1f   : > { %p864_p12 = scmp.lt.u32.totalorder %s855_s24, %s1173_s10 }
  0x20   : > { %p859_p7 = pneg %p858_p6  ;;  %p863_p13 = por %p862_p10, %p861_p4 }
  0x22   : > { %p865_p1 = por %p864_p12, %p863_p13 }
  0x24   : > { %p866_p2 = pnand %p865_p1, %p859_p7 }
  0x26   : > { %869 = shalt.err (!%p866_p2)
}
  0x27   : > { %s870_s9 = scalar_lea.vmem %s1175_s12, 128  ;;  %s1063_s11 = smov [#allocation5]  }
  0x28   : > { %p871_p3 = scmp.ne.s32.totalorder %s1175_s12, %s870_s9  ;;  %s875_s26 = sshll.u32 %s1063_s11, 4  ;;  %s876_s26 = int_to_ptr.vmem [resolvable:$false] %s875_s26 }
  0x29   : > { %s877_s6 = scalar_lea.vmem %s876_s26, 256  ;;  %p878_p9 = scmp.lt.s32.totalorder %s1175_s12, %s876_s26 }
  0x2a   : > { %p873_p6 = pnand %p871_p3, %p857_p5  ;;  %p879_p4 = scmp.lt.s32.totalorder %s877_s6, %s870_s9 }
  0x2c   : > { %p874_p11 = pneg %p873_p6  ;;  %p880_p10 = por %p879_p4, %p878_p9 }
  0x2e   : > { %p881_p12 = pnand %p880_p10, %p874_p11 }
  0x30   : > { %884 = shalt.err (!%p881_p12)
}
  0x31   : > { %778 = dma.hbm_to_vmem [thread:$0]  (!%p1179_p0), %s1173_s10, 128, %s1175_s12, %s209_s14  }
  0x32   : > { %p1432_p1 = scmp.lt.s32.totalorder %s1061_s20, 3  ;;  %p1433_p2 = scmp.ge.s32.totalorder %s1061_s20, 1 }
  0x33   : > { %s744_s25 = sshll.u32 %s1166_s5, 1  ;;  %s762_s7 = sshll.u32 %s1057_s19, 5 }
  0x34   : > { %p1215_p7 = pnand %p1433_p2, %p1432_p1  ;;  %s1224_s11 = scalar_lea.hbm %s1420_s1, %s762_s7 }
  0x35   : > { %s234_s26 = scalar_lea.vmem [#allocation8], %s744_s25  ;;  %s231_s10 = scalar_lea.sflag [#allocation9], %s1166_s5 }
  0x36   : > { %s1434_s24 = scalar_select %p1215_p7, 1, 0 }
  0x37   : > { %s245_s6 = sshll.u32 %s234_s26, 4  ;;  %s885_s12 = scalar_lea.hbm %s1224_s11, 32  ;;  %s246_s6 = int_to_ptr.vmem [resolvable:$true] %s245_s6 }
  0x38   : > { %p886_p9 = scmp.ne.s32.totalorder %s1224_s11, %s885_s12  ;;  %s890_s8 = scalar_lea.hbm %s1420_s1, 64 }
  0x39   : > { %p891_p3 = scmp.lt.u32.totalorder %s1224_s11, %s1420_s1  ;;  %p892_p6 = scmp.lt.u32.totalorder %s890_s8, %s885_s12 }
  0x3a   : > { %p888_p11 = pnand %p886_p9, %p857_p5  ;;  %p894_p10 = scmp.lt.u32.totalorder %s885_s12, %s1224_s11 }
  0x3b   : > { %p893_p4 = por %p892_p6, %p891_p3 }
  0x3c   : > { %p889_p13 = pneg %p888_p11 }
  0x3d   : > { %p895_p12 = por %p894_p10, %p893_p4 }
  0x3f   : > { %p896_p1 = pnand %p895_p12, %p889_p13 }
  0x41   : > { %899 = shalt.err (!%p896_p1)
}
  0x42   : > { %s900_s5 = scalar_lea.vmem %s246_s6, 32  ;;  %s1064_s25 = smov [#allocation8]  }
  0x43   : > { %p901_p2 = scmp.ne.s32.totalorder %s246_s6, %s900_s5  ;;  %s905_s22 = sshll.u32 %s1064_s25, 4  ;;  %s906_s22 = int_to_ptr.vmem [resolvable:$false] %s905_s22 }
  0x44   : > { %s907_s26 = scalar_lea.vmem %s906_s22, 64  ;;  %p908_p8 = scmp.lt.s32.totalorder %s246_s6, %s906_s22 }
  0x45   : > { %p903_p9 = pnand %p901_p2, %p857_p5  ;;  %p909_p7 = scmp.lt.s32.totalorder %s907_s26, %s900_s5 }
  0x47   : > { %p904_p11 = pneg %p903_p9  ;;  %p910_p3 = por %p909_p7, %p908_p8 }
  0x49   : > { %p911_p6 = pnand %p910_p3, %p904_p11 }
  0x4b   : > { %914 = shalt.err (!%p911_p6)
}
  0x4c   : > { %781 = dma.hbm_to_vmem [thread:$0]  (!%p1179_p0), %s1224_s11, 32, %s246_s6, %s231_s10  }
  0x4d   : > { %p1435_p13 = scmp.ne.s32.totalorder %s1434_s24, 0 }
  0x4e   : > { %s1249_s12 = sand.u32 (!%p1435_p13), 1, %s1045_s16   ;;  %p1436_p5 = scmp.ne.s32.totalorder (!%p1435_p13), %s1428_s27, 0 }
  0x4f   : > { %254 = sbr.rel (%p1435_p13) target bundleno = 426 (0x1aa), region = 28  ;;  %s748_s14 = sshll.u32 (!%p1435_p13), %s1249_s12, 3 }
  0x50   : > { %s257_s8 = scalar_lea.sflag (!%p1435_p13), [#allocation6], %s1249_s12  ;;  %s260_s7 = scalar_lea.vmem (!%p1435_p13), [#allocation5], %s748_s14 }
  0x56   : > { %1024 = dma.done.wait (%p1436_p5), %s257_s8, 128  }
  0x57   : > { %1026 = vsyncadd (%p1436_p5), %s257_s8, 4294967168  ;;  %s749_s13 = sshll.u32 %s1249_s12, 1  ;;  %s266_s24 = scalar_lea.sflag [#allocation9], %s1249_s12 }
  0x58   : > { %s269_s11 = scalar_lea.vmem [#allocation8], %s749_s13 }
  0x59   : > { %1028 = dma.done.wait (%p1436_p5), %s266_s24, 32  }
  0x5a   : > { %1030 = vsyncadd (%p1436_p5), %s266_s24, 4294967264  ;;  %v316_v0 = vlaneseq  ;;  %v1065_v2 = vmov 0.0   ;;  %vm344_vm1 = vcmask 1043456   ;;  %v325_v3 = vld [vmem:[%s260_s7] sm:$0xff]  ;;  %v326_v19 = vld [vmem:[%s269_s11] sm:$0x3] }
  0x5b   : > { %v342_v4 = vcombine.high %v325_v3, %v325_v3  ;;  %v345_v5 = vsel %vm344_vm1, %v325_v3, -inf  ;;  %v1066_v61 = vmov 1966171168   ;;  %vm478_vm4 = vcmask 1040384   ;;  %s750_s27 = sshll.u32 %s1249_s12, 2  ;;  %s517_s5 = sand.u32 1, %s1126_s21  }
  0x5c   : > { %vm1263_vm0 = vcmp.lt.s32.totalorder %v316_v0, 256  ;;  %v346_v6 = vrot.slane %v345_v5, 4  ;;  %v1271_v10 = vshrl.u32 %v316_v0, 7  ;;  %v437_v62 = vunpack.c.l.s4 %v1066_v61  ;;  %s307_s6 = scalar_lea.vmem [#allocation13], %s750_s27  ;;  %s300_s10 = scalar_lea.vmem [#allocation11], %s750_s27 }
  0x5d   : > { %320 = vst.msk [vmem:[#allocation2] sm:$0x3] %vm1263_vm0, %v1065_v2  ;;  %v352_v7 = vsel %vm344_vm1, %v342_v4, -inf  ;;  %s551_s9 = sshll.u32 %s300_s10, 4  ;;  %s757_s25 = sshll.u32 %s1053_s18, 6  ;;  %s1303_s9 = int_to_ptr.vmem [resolvable:$true] %s551_s9 }
  0x5e   : > { %v347_v8 = vmax.f32 %v345_v5, %v346_v6  ;;  %v353_v9 = vrot.slane %v352_v7, 4  ;;  %v329_v15 = vsub.s32 0, %v1271_v10  ;;  %v333_v16 = vsub.s32 1, %v1271_v10  ;;  %s565_s22 = sshll.u32 %s307_s6, 4  ;;  %s1308_s8 = scalar_lea.hbm %s1422_s3, %s757_s25  ;;  %s1310_s22 = int_to_ptr.vmem [resolvable:$true] %s565_s22 }
  0x5f   : > { %s1315_s21 = scalar_lea.hbm %s1423_s4, %s757_s25  ;;  %s1317_s24 = scalar_lea.sflag [#allocation12], %s517_s5 }
  0x60   : > { %v348_v11 = vrot.slane %v347_v8, 2  ;;  %v354_v12 = vmax.f32 %v352_v7, %v353_v9  ;;  %v330_v22 = vrot.slane %v326_v19, %v329_v15  ;;  %v334_v23 = vrot.slane %v326_v19, %v333_v16  ;;  %s915_s11 = scalar_lea.vmem %s1303_s9, 64  ;;  %p1439_p0 = scmp.ne.s32.totalorder %s1429_s28, 0 }
  0x61   : > { %p916_p8 = scmp.ne.s32.totalorder %s1303_s9, %s915_s11  ;;  %s1067_s27 = smov [#allocation11]  }
  0x62   : > { %v349_v13 = vmax.f32 %v347_v8, %v348_v11  ;;  %v355_v14 = vrot.slane %v354_v12, 2  ;;  %vm335_vm2 = vcmp.eq.s32.totalorder %v1271_v10, %v330_v22  ;;  %vm336_vm3 = vcmp.eq.s32.totalorder %v1271_v10, %v334_v23 }
  0x63   : > { %v752_v28 = vsel %vm335_vm2, 1.0, %v1065_v2  ;;  %v753_v29 = vsel %vm336_vm3, 1.0, %v1065_v2  ;;  %v438_v11 = vunpack.c.0.s8 %v437_v62  ;;  %p917_p7 = pnand %p916_p8, %p1439_p0 }
  0x64   : > { %v350_v17 = vrot.slane %v349_v13, 1  ;;  %v356_v18 = vmax.f32 %v354_v12, %v355_v14  ;;  %v1281_v30 = vcombine.low %v752_v28, %v753_v29  ;;  %v432_v28 = vld [vmem:[#allocation2] sm:$0x3] }
  0x65   : > { %v441_v22 = vsub.s32 %v438_v11, %v1271_v10  ;;  %p918_p4 = pneg %p917_p7 }
  0x66   : > { %v351_v20 = vmax.f32 %v349_v13, %v350_v17  ;;  %v357_v21 = vrot.slane %v356_v18, 1  ;;  %v387_v31 = vmul.f32 %v1281_v30, %v325_v3 }
  0x68   : > { %v358_v24 = vmax.f32 %v356_v18, %v357_v21  ;;  %v389_v33 = vcombine.high %v387_v31, %v387_v31  ;;  %v391_v37 = vsel %vm344_vm1, %v387_v31, 0.0 }
  0x69   : > { %v392_v42 = vrot.slane %v391_v37, 4 }
  0x6a   : > { %v361_v25 = vcombine.low %v351_v20, %v358_v24  ;;  %v398_v41 = vsel %vm344_vm1, %v389_v33, 0.0 }
  0x6b   : > { %v399_v45 = vrot.slane %v398_v41, 4  ;;  %v393_v48 = vadd.f32 %v392_v42, %v391_v37 }
  0x6c   : > { %v363_v26 = vsub.f32 %v325_v3, %v361_v25 }
  0x6d   : > { %v400_v51 = vadd.f32 %v399_v45, %v398_v41  ;;  %v394_v54 = vrot.slane %v393_v48, 2 }
  0x6e   : > { %v364_v27 = vmul.f32 1.442695, %v363_v26 }
  0x6f   : > { %v401_v56 = vrot.slane %v400_v51, 2  ;;  %v395_v57 = vadd.f32 %v394_v54, %v393_v48 }
  0x70   : > { %845 = vpow2.f32 %v364_v27 }
  0x71   : > { %v402_v58 = vadd.f32 %v401_v56, %v400_v51  ;;  %v396_v59 = vrot.slane %v395_v57, 1 }
  0x73   : > { %v403_v60 = vrot.slane %v402_v58, 1  ;;  %v397_v2 = vadd.f32 %v396_v59, %v395_v57 }
  0x75   : > { %v404_v7 = vadd.f32 %v403_v60, %v402_v58 }
  0x7a   : > { %v846_v32 = vpop.eup %845 }
  0x7b   : > { %v367_v34 = vcombine.high %v846_v32, %v846_v32  ;;  %v369_v35 = vsel %vm344_vm1, %v846_v32, 0.0 }
  0x7c   : > { %v370_v36 = vrot.slane %v369_v35, 4 }
  0x7d   : > { %v376_v38 = vsel %vm344_vm1, %v367_v34, 0.0 }
  0x7e   : > { %v371_v39 = vadd.f32 %v370_v36, %v369_v35  ;;  %v377_v40 = vrot.slane %v376_v38, 4 }
  0x80   : > { %v372_v43 = vrot.slane %v371_v39, 2  ;;  %v378_v44 = vadd.f32 %v377_v40, %v376_v38 }
  0x82   : > { %v373_v46 = vadd.f32 %v372_v43, %v371_v39  ;;  %v379_v47 = vrot.slane %v378_v44, 2 }
  0x84   : > { %v374_v49 = vrot.slane %v373_v46, 1  ;;  %v380_v50 = vadd.f32 %v379_v47, %v378_v44 }
  0x86   : > { %v375_v52 = vadd.f32 %v374_v49, %v373_v46  ;;  %v381_v53 = vrot.slane %v380_v50, 1 }
  0x88   : > { %v382_v55 = vadd.f32 %v381_v53, %v380_v50  ;;  %847 = vlog2.f32 %v375_v52 }
  0x89   : > { %849 = vrcp.f32 %v375_v52 }
  0x8a   : > { %851 = vlog2.f32 %v382_v55 }
  0x8b   : > { %853 = vrcp.f32 %v382_v55 }
  0x92   : > { %v848_v63 = vpop.eup %847 }
  0x93   : > { %v850_v0 = vpop.eup %849  ;;  %v406_v3 = vmul.f32 0.6931472, %v848_v63 }
  0x94   : > { %v852_v4 = vpop.eup %851  ;;  %v415_v5 = vmul.f32 %v850_v0, %v375_v52 }
  0x95   : > { %v854_v6 = vpop.eup %853  ;;  %v408_v8 = vmul.f32 0.6931472, %v852_v4  ;;  %v409_v9 = vadd.f32 %v406_v3, %v351_v20 }
  0x96   : > { %v416_v12 = vmul.f32 %v854_v6, %v382_v55  ;;  %v417_v13 = vsub.f32 2.0, %v415_v5 }
  0x97   : > { %v410_v14 = vadd.f32 %v408_v8, %v358_v24  ;;  %v411_v17 = vsub.f32 %v409_v9, %v397_v2 }
  0x98   : > { %v418_v18 = vsub.f32 2.0, %v416_v12  ;;  %v419_v19 = vmul.f32 %v850_v0, %v417_v13 }
  0x99   : > { %v412_v21 = vsub.f32 %v410_v14, %v404_v7 }
  0x9a   : > { %v420_v23 = vmul.f32 %v854_v6, %v418_v18 }
  0x9b   : > { %v435_v25 = vcombine.low %v411_v17, %v412_v21 }
  0x9c   : > { %v423_v26 = vcombine.low %v419_v19, %v420_v23 }
  0x9d   : > { %v442_v27 = vrot.slane %v435_v25, %v441_v22 }
  0x9e   : > { %v425_v29 = vmul.f32 %v846_v32, %v423_v26 }
  0x9f   : > { %v449_v31 = vrot.slane %v442_v27, %v441_v22 }
  0xa0   : > { %v427_v33 = vmul.f32 %v425_v29, %v425_v29  ;;  %v426_v36 = vmul.f32 %v425_v29, %v1281_v30 }
  0xa1   : > { %v451_v34 = vadd.f32 %v449_v31, %v432_v28 }
  0xa2   : > { %v502_v20 = vcombine.high %v427_v33, %v427_v33  ;;  %v504_v35 = vsel %vm344_vm1, %v427_v33, 0.0  ;;  %v493_v38 = vcombine.high %v426_v36, %v426_v36  ;;  %v495_v42 = vsel %vm344_vm1, %v426_v36, 0.0 }
  0xa3   : > { %456 = vst.msk [vmem:[#allocation2] sm:$0x3] %vm1263_vm0, %v451_v34 }
  0xa4   : > { %v505_v24 = vsel %vm344_vm1, %v502_v20, 0.0  ;;  %v496_v30 = vsel %vm344_vm1, %v493_v38, 0.0 }
  0xa5   : > { %v506_v37 = vadd.f32 %v505_v24, %v504_v35  ;;  %v497_v44 = vadd.f32 %v496_v30, %v495_v42 }
  0xa7   : > { %507 = vadd.xlane.f32.xlu1 %v506_v37 }
  0xaa   : > { %v466_v39 = vld [vmem:[#allocation2] sm:$0x3] }
  0xab   : > { %v471_v32 = vrot.slane %v466_v39, %v329_v15  ;;  %v475_v40 = vrot.slane %v466_v39, %v333_v16 }
  0xad   : > { %v479_v41 = vsel %vm478_vm4, %v471_v32, 0.0  ;;  %v480_v1 = vsel %vm478_vm4, %v475_v40, 0.0 }
  0xae   : > { %v481_v43 = vadd.f32 %v480_v1, %v479_v41 }
  0xb0   : > { %482 = vadd.xlane.f32.xlu0 %v481_v43 }
  0xb4   : > { %498 = vadd.xlane.f32.xlu0 %v497_v44 }
 0x134   : > { %v508_v45 = vpop.xlane.xlu1 %507 }
 0x135   : > { %512 = vst [vmem:[%s307_s6] sm:$0xf] %v508_v45  ;;  %s919_s6 = sshll.u32 %s1067_s27, 4  ;;  %s920_s6 = int_to_ptr.vmem [resolvable:$false] %s919_s6 }
 0x136   : > { %s921_s26 = scalar_lea.vmem %s920_s6, 128  ;;  %p922_p10 = scmp.lt.s32.totalorder %s1303_s9, %s920_s6 }
 0x137   : > { %p923_p12 = scmp.lt.s32.totalorder %s921_s26, %s915_s11 }
 0x139   : > { %p924_p1 = por %p923_p12, %p922_p10 }
 0x13b   : > { %p925_p2 = pnand %p924_p1, %p918_p4 }
 0x13d   : > { %v483_v10 = vpop.xlane.xlu0 %482 }
 0x13e   : > { %v484_v15 = vrot.slane %v483_v10, 4 }
 0x140   : > { %v485_v16 = vadd.f32 %v484_v15, %v483_v10 }
 0x141   : > { %v499_v46 = vpop.xlane.xlu0 %498 }
 0x142   : > { %v486_v47 = vrot.slane %v485_v16, 2  ;;  %511 = vst [vmem:[%s300_s10] sm:$0xf] %v499_v46 }
 0x143   : > { %928 = shalt.err (!%p925_p2)
}
 0x144   : > { %s929_s10 = scalar_lea.hbm %s1308_s8, 64  ;;  %s933_s14 = scalar_lea.hbm %s1422_s3, 128 }
 0x145   : > { %p930_p9 = scmp.ne.s32.totalorder %s1308_s8, %s929_s10  ;;  %p934_p6 = scmp.lt.u32.totalorder %s1308_s8, %s1422_s3 }
 0x146   : > { %p935_p13 = scmp.lt.u32.totalorder %s933_s14, %s929_s10  ;;  %p937_p8 = scmp.lt.u32.totalorder %s929_s10, %s1308_s8 }
 0x147   : > { %p931_p11 = pnand %p930_p9, %p1439_p0 }
 0x148   : > { %p936_p5 = por %p935_p13, %p934_p6 }
 0x149   : > { %p932_p3 = pneg %p931_p11 }
 0x14a   : > { %p938_p7 = por %p937_p8, %p936_p5 }
 0x14c   : > { %p939_p4 = pnand %p938_p7, %p932_p3 }
 0x14e   : > { %942 = shalt.err (!%p939_p4)
}
 0x14f   : > { %770 = dma.vmem_to_hbm [thread:$0]  (%p1439_p0), %s1303_s9, 64, %s1308_s8, %s1317_s24   ;;  %v487_v48 = vadd.f32 %v486_v47, %v485_v16 }
 0x150   : > { %s943_s11 = scalar_lea.vmem %s1310_s22, 64  ;;  %s1068_s27 = smov [#allocation13]  }
 0x151   : > { %p944_p10 = scmp.ne.s32.totalorder %s1310_s22, %s943_s11  ;;  %s947_s6 = sshll.u32 %s1068_s27, 4  ;;  %s948_s6 = int_to_ptr.vmem [resolvable:$false] %s947_s6 }
 0x152   : > { %s949_s26 = scalar_lea.vmem %s948_s6, 128  ;;  %p950_p2 = scmp.lt.s32.totalorder %s1310_s22, %s948_s6 }
 0x153   : > { %p945_p12 = pnand %p944_p10, %p1439_p0  ;;  %p951_p9 = scmp.lt.s32.totalorder %s949_s26, %s943_s11 }
 0x155   : > { %p946_p1 = pneg %p945_p12  ;;  %p952_p11 = por %p951_p9, %p950_p2 }
 0x157   : > { %p953_p3 = pnand %p952_p11, %p946_p1 }
 0x159   : > { %956 = shalt.err (!%p953_p3)
}
 0x15a   : > { %s957_s9 = scalar_lea.hbm %s1315_s21, 64  ;;  %s961_s5 = scalar_lea.hbm %s1423_s4, 128 }
 0x15b   : > { %p958_p6 = scmp.ne.s32.totalorder %s1315_s21, %s957_s9  ;;  %p962_p8 = scmp.lt.u32.totalorder %s1315_s21, %s1423_s4 }
 0x15c   : > { %p963_p7 = scmp.lt.u32.totalorder %s961_s5, %s957_s9  ;;  %p965_p10 = scmp.lt.u32.totalorder %s957_s9, %s1315_s21 }
 0x15d   : > { %p959_p13 = pnand %p958_p6, %p1439_p0 }
 0x15e   : > { %p964_p4 = por %p963_p7, %p962_p8 }
 0x15f   : > { %p960_p5 = pneg %p959_p13 }
 0x160   : > { %p966_p12 = por %p965_p10, %p964_p4 }
 0x162   : > { %p967_p1 = pnand %p966_p12, %p960_p5 }
 0x164   : > { %970 = shalt.err (!%p967_p1)
}
 0x165   : > { %771 = dma.vmem_to_hbm [thread:$0]  (%p1439_p0), %s1310_s22, 64, %s1315_s21, %s1317_s24   ;;  %v488_v49 = vrot.slane %v487_v48, 1 }
 0x166   : > { %s293_s7 = scalar_lea.vmem [#allocation10], %s1249_s12  ;;  %s756_s11 = sshll.u32 %s1053_s18, 4 }
 0x167   : > { %v489_v50 = vadd.f32 %v488_v49, %v487_v48  ;;  %s537_s13 = sshll.u32 %s293_s7, 4  ;;  %s1370_s9 = scalar_lea.hbm %s1421_s2, %s756_s11  ;;  %s1365_s13 = int_to_ptr.vmem [resolvable:$true] %s537_s13 }
 0x168   : > { %s514_s22 = scalar_lea.sflag [#allocation7], %s1249_s12  ;;  %s971_s21 = scalar_lea.vmem %s1365_s13, 16 }
 0x169   : > { %763 = vpush %v489_v50  ;;  %p972_p2 = scmp.ne.s32.totalorder %s1365_s13, %s971_s21  ;;  %s1069_s18 = smov [#allocation10]  }
 0x16a   : > { %s975_s24 = sshll.u32 %s1069_s18, 4  ;;  %s976_s24 = int_to_ptr.vmem [resolvable:$false] %s975_s24 }
 0x16b   : > { %p973_p9 = pnand %p972_p2, %p1439_p0  ;;  %s977_s8 = scalar_lea.vmem %s976_s24, 32 }
 0x16c   : > { %p978_p3 = scmp.lt.s32.totalorder %s1365_s13, %s976_s24  ;;  %p979_p6 = scmp.lt.s32.totalorder %s977_s8, %s971_s21 }
 0x16d   : > { %p974_p11 = pneg %p973_p9 }
 0x16e   : > { %p980_p13 = por %p979_p6, %p978_p3 }
 0x170   : > { %p981_p5 = pnand %p980_p13, %p974_p11 }
 0x19a   : > { %s764_s27 = spop %763 }
 0x19b   : > { %v509_v51 = vstv %s764_s27 }
 0x19c   : > { %510 = vst [vmem:[%s293_s7] sm:$0x1] %v509_v51 }
 0x19d   : > { %984 = shalt.err (!%p981_p5)
}
 0x19e   : > { %s985_s12 = scalar_lea.hbm %s1370_s9, 16  ;;  %s989_s25 = scalar_lea.hbm %s1421_s2, 32 }
 0x19f   : > { %p986_p8 = scmp.ne.s32.totalorder %s1370_s9, %s985_s12  ;;  %p990_p10 = scmp.lt.u32.totalorder %s1370_s9, %s1421_s2 }
 0x1a0   : > { %p991_p12 = scmp.lt.u32.totalorder %s989_s25, %s985_s12  ;;  %p993_p2 = scmp.lt.u32.totalorder %s985_s12, %s1370_s9 }
 0x1a1   : > { %p987_p7 = pnand %p986_p8, %p1439_p0 }
 0x1a2   : > { %p992_p1 = por %p991_p12, %p990_p10 }
 0x1a3   : > { %p988_p4 = pneg %p987_p7 }
 0x1a4   : > { %p994_p9 = por %p993_p2, %p992_p1 }
 0x1a6   : > { %p995_p11 = pnand %p994_p9, %p988_p4 }
 0x1a8   : > { %998 = shalt.err (!%p995_p11)
}
 0x1a9   : > { %769 = dma.vmem_to_hbm [thread:$0]  (%p1439_p0), %s1365_s13, 16, %s1370_s9, %s514_s22  }
 0x1aa PF: > { %s577_s11 = sand.u32 1, %s1041_s15   ;;  %p1440_p3 = scmp.ne.s32.totalorder %s1430_s30, 0 }
 0x1ab   : > { %p1441_p6 = scmp.ge.s32.totalorder %s1061_s20, 2  ;;  %s578_s27 = scalar_lea.sflag [#allocation7], %s577_s11 }
 0x1ad   : > { %p783_p13 = pnand %p1441_p6, %p1440_p3 }
 0x1af   : > { %1032 = dma.done.wait (!%p783_p13), %s578_s27, 16  }
 0x1b0   : > { %1034 = vsyncadd (!%p783_p13), %s578_s27, 4294967280  ;;  %s1442_s6 = sadd.s32 4294967294, %s1061_s20  }
 0x1b1   : > { %s585_s26 = sand.u32 1, %s1442_s6  }
 0x1b2   : > { %s586_s21 = scalar_lea.sflag [#allocation12], %s585_s26 }
 0x1b3   : > { %1036 = dma.done.wait (!%p783_p13), %s586_s21, 128  }
 0x1b4   : > { %1038 = vsyncadd (!%p783_p13), %s586_s21, 4294967168  ;;  %s27_s20 = sadd.s32 1, %s1061_s20   ;;  %s1443_s15 = smov %s1045_s16 }
 0x1b5   : > { %p24_p0 = scmp.ge.s32.totalorder %s27_s20, 4   ;;  %s1444_s16 = smov %s1049_s17 }
 0x1b6   : > { %s1445_s17 = smov %s1157_s29  ;;  %s1446_s18 = smov %s1057_s19 }
 0x1b7   : > { %s1447_s19 = smov %s1449_s23  ;;  %26 = sbr.rel (!%p24_p0) target bundleno = 10 (0xa), region = 126 }
 0x1be   :  { %600 = vsyncpa [#allocation6], 1 }
 0x1bf   :  { %602 = vsyncpa [#allocation6 + $0x1], 1 }
 0x1c0   :  { %603 = vsyncpa [#allocation9], 1 }
 0x1c1   :  { %605 = vsyncpa [#allocation9 + $0x1], 1 }
 0x1c2   :  { %606 = vsyncpa [#allocation7], 1 }
 0x1c3   :  { %608 = vsyncpa [#allocation7 + $0x1], 1 }
 0x1c4   :  { %609 = vsyncpa [#allocation12], 1 }
 0x1c5   :  { %611 = vsyncpa [#allocation12 + $0x1], 1 }

</bundles_post_ra>
